<compile_context>
chip_gen: v7x
topology: tpu7x:2x2x1
jax: 0.10.0
libtpu: 0.0.40
codegen_flags: <defaults>
</compile_context>

<pallas_src>
import functools
import math

import jax
import jax.numpy as jnp
from jax.experimental import pallas as pl
from jax.experimental.pallas import tpu as pltpu

LANE = 128


def _round_up(v, m):
    return (v + m - 1) // m * m


def _pick_tile(n_pad):
    # VMEM-friendly on all of v5e / v6e / v7x: a 512x512 bf16 A-tile pair is
    # only ~1 MiB double-buffered, far under the 16/32 MiB scoped defaults.
    for t in (512, 256, 128):
        if n_pad % t == 0:
            return t
    return 128


def _pad2d(x, rows, cols):
    return jnp.pad(x, ((0, rows - x.shape[0]), (0, cols - x.shape[1])))


# ----------------------------------------------------------------------------
# Kernels
# ----------------------------------------------------------------------------
def _gcn_layer1_kernel(a_ref, x_ref, w_ref, b_ref, h_ref, acc_ref):
    """Row tile of  H = relu((A_hat @ X) @ W1 + b1), accumulated over k."""
    k = pl.program_id(1)

    @pl.when(k == 0)
    def _init():
        acc_ref[...] = jnp.zeros_like(acc_ref)

    # Aggregation matmul: bf16 inputs, f32 accumulation on the MXU.
    acc_ref[...] += jnp.dot(a_ref[...], x_ref[...],
                            preferred_element_type=jnp.float32)

    @pl.when(k == pl.num_programs(1) - 1)
    def _finalize():
        z = jnp.dot(acc_ref[...].astype(jnp.bfloat16), w_ref[...],
                    preferred_element_type=jnp.float32) + b_ref[...]
        # TODO(synk): F.dropout(training=True) omitted -- identity in eval mode.
        h_ref[...] = jnp.maximum(z, 0.0).astype(h_ref.dtype)


def _gcn_layer2_kernel(a_ref, h_ref, w_ref, b_ref, emb_ref, out_ref, acc_ref,
                       *, c_valid):
    """Row tile of  Z = (A_hat @ H1) @ W2 + b2  plus masked log_softmax."""
    k = pl.program_id(1)

    @pl.when(k == 0)
    def _init():
        acc_ref[...] = jnp.zeros_like(acc_ref)

    acc_ref[...] += jnp.dot(a_ref[...], h_ref[...],
                            preferred_element_type=jnp.float32)

    @pl.when(k == pl.num_programs(1) - 1)
    def _finalize():
        z = jnp.dot(acc_ref[...].astype(jnp.bfloat16), w_ref[...],
                    preferred_element_type=jnp.float32) + b_ref[...]
        emb_ref[...] = z                      # self.embedding (padded slab)

        # log_softmax over the *valid* class columns only (lane dim padded).
        col = jax.lax.broadcasted_iota(jnp.int32, z.shape, 1)
        valid = col < c_valid
        zm = jnp.where(valid, z, -jnp.inf)
        m = jnp.max(zm, axis=1, keepdims=True)
        p = jnp.where(valid, jnp.exp(zm - m), 0.0)
        lse = m + jnp.log(jnp.sum(p, axis=1, keepdims=True))
        out_ref[...] = jnp.where(valid, z - lse, 0.0)


# ----------------------------------------------------------------------------
# Tiled layer launcher
# ----------------------------------------------------------------------------
def _run_layer(kernel, a, xin, w, b, out_shapes, *, tm, tk):
    n_pad = a.shape[0]
    fin = xin.shape[1]
    fout = w.shape[1]
    grid = (n_pad // tm, n_pad // tk)

    flops = 2 * n_pad * n_pad * fin + 2 * n_pad * fin * fout
    bytes_accessed = (
        a.size * a.dtype.itemsize                     # A_hat read once
        + grid[0] * xin.size * xin.dtype.itemsize     # dense factor re-read per row tile
        + w.size * w.dtype.itemsize
        + b.size * b.dtype.itemsize
        + sum(math.prod(s.shape) * jnp.dtype(s.dtype).itemsize for s in out_shapes)
    )
    cost = pl.CostEstimate(flops=flops,
                           transcendentals=n_pad * fout,
                           bytes_accessed=bytes_accessed)

    return pl.pallas_call(
        kernel,
        out_shape=tuple(out_shapes),
        grid=grid,
        in_specs=[
            pl.BlockSpec((tm, tk), lambda i, k: (i, k)),      # A_hat tile
            pl.BlockSpec((tk, fin), lambda i, k: (k, 0)),     # dense factor tile
            pl.BlockSpec((fin, fout), lambda i, k: (0, 0)),   # W (VMEM resident)
            pl.BlockSpec((1, fout), lambda i, k: (0, 0)),     # bias
        ],
        out_specs=tuple(pl.BlockSpec((tm, fout), lambda i, k: (i, 0))
                        for _ in out_shapes),
        scratch_shapes=[pltpu.VMEM((tm, fin), jnp.float32)],
        compiler_params=pltpu.CompilerParams(
            dimension_semantics=("parallel", "arbitrary"),
            vmem_limit_bytes=32 * 1024 * 1024,
        ),
        cost_estimate=cost,
    )(a, xin, w, b)


def gcn_forward(a_hat, x, w1, b1, w2, b2):
    n, f = x.shape
    h = w1.shape[1]
    c = w2.shape[1]

    n_pad = _round_up(n, LANE)
    f_pad = _round_up(f, LANE)
    h_pad = _round_up(h, LANE)
    c_pad = _round_up(c, LANE)
    tm = tk = _pick_tile(n_pad)

    # Zero-pad to lane width and cast matmul operands to bf16 (f32 accumulate).
    a_bf = _pad2d(a_hat, n_pad, n_pad).astype(jnp.bfloat16)
    x_bf = _pad2d(x, n_pad, f_pad).astype(jnp.bfloat16)
    w1_bf = _pad2d(w1, f_pad, h_pad).astype(jnp.bfloat16)
    w2_bf = _pad2d(w2, h_pad, c_pad).astype(jnp.bfloat16)
    b1_p = _pad2d(b1.reshape(1, -1).astype(jnp.float32), 1, h_pad)
    b2_p = _pad2d(b2.reshape(1, -1).astype(jnp.float32), 1, c_pad)

    # Layer 1: H1 = relu((A @ X) @ W1 + b1)   (bf16 activation slab, N_pad x H_pad)
    (h1,) = _run_layer(
        _gcn_layer1_kernel, a_bf, x_bf, w1_bf, b1_p,
        (jax.ShapeDtypeStruct((n_pad, h_pad), jnp.bfloat16),),
        tm=tm, tk=tk)

    # Layer 2: Z = (A @ H1) @ W2 + b2 ; embedding + masked log_softmax.
    emb_pad, logp_pad = _run_layer(
        functools.partial(_gcn_layer2_kernel, c_valid=c),
        a_bf, h1, w2_bf, b2_p,
        (jax.ShapeDtypeStruct((n_pad, c_pad), jnp.float32),
         jax.ShapeDtypeStruct((n_pad, c_pad), jnp.float32)),
        tm=tm, tk=tk)

    return emb_pad[:n, :c], logp_pad[:n, :c]


# ----------------------------------------------------------------------------
# Glue: build D^-1/2 (A + I) D^-1/2 as a dense matrix (PyG GCNConv semantics)
# ----------------------------------------------------------------------------
def build_norm_adj(edge_index, num_nodes):
    src = edge_index[0]
    dst = edge_index[1]
    loop = jnp.arange(num_nodes, dtype=edge_index.dtype)
    src = jnp.concatenate([src, loop])                 # add self-loops
    dst = jnp.concatenate([dst, loop])
    w = jnp.ones(src.shape[0], dtype=jnp.float32)
    deg = jnp.zeros((num_nodes,), jnp.float32).at[dst].add(w)
    dinv = jnp.where(deg > 0, 1.0 / jnp.sqrt(deg), 0.0)
    norm = dinv[src] * dinv[dst] * w
    # message from src aggregated at dst  ->  A_hat[dst, src]
    a_hat = jnp.zeros((num_nodes, num_nodes), jnp.float32).at[dst, src].add(norm)
    return a_hat


def glorot(key, shape):
    fan_in, fan_out = shape
    limit = jnp.sqrt(6.0 / (fan_in + fan_out))
    return jax.random.uniform(key, shape, jnp.float32, -limit, limit)


if __name__ == "__main__":
    # Small synthetic graph consistent with GCNNet(features, neurons, classes).
    num_nodes = 16
    features = 8
    neurons = 32
    classes = 4
    num_edges = 24

    key = jax.random.PRNGKey(0)
    k_x, k_src, k_dst, k_w1, k_w2 = jax.random.split(key, 5)

    x = jax.random.normal(k_x, (num_nodes, features), jnp.float32)
    edge_index = jnp.stack([
        jax.random.randint(k_src, (num_edges,), 0, num_nodes),
        jax.random.randint(k_dst, (num_edges,), 0, num_nodes),
    ]).astype(jnp.int32)                               # [2, E]

    # Deterministic parameter init (GCNConv: glorot weights, zero bias).
    w1 = glorot(k_w1, (features, neurons))
    b1 = jnp.zeros((1, neurons), jnp.float32)
    w2 = glorot(k_w2, (neurons, classes))
    b2 = jnp.zeros((1, classes), jnp.float32)

    a_hat = build_norm_adj(edge_index, num_nodes)

    fwd = jax.jit(gcn_forward)
    embedding, log_probs = fwd(a_hat, x, w1, b1, w2, b2)
    jax.block_until_ready((embedding, log_probs))

    # Sanity check against pure-JAX f32 reference (loose tol: bf16 MXU inputs).
    h_ref = jnp.maximum(a_hat @ (x @ w1) + b1, 0.0)
    z_ref = a_hat @ (h_ref @ w2) + b2
    ref = jax.nn.log_softmax(z_ref, axis=1)
    assert embedding.shape == (num_nodes, classes)
    assert log_probs.shape == (num_nodes, classes)
    assert jnp.allclose(embedding, z_ref, atol=5e-2, rtol=5e-2)
    assert jnp.allclose(log_probs, ref, atol=5e-2, rtol=5e-2)
    # log_softmax rows must exponentiate-sum to 1.
    assert jnp.allclose(jnp.sum(jnp.exp(log_probs), axis=1), 1.0, atol=1e-3)

    print("KERNEL_OK")
</pallas_src>

<mosaic_0001>
module attributes {stable_mosaic.version = 11 : i64} {
  func.func @_gcn_layer1_kernel(%arg0: i32, %arg1: i32, %arg2: memref<128x128xbf16, #tpu.memory_space<vmem>>, %arg3: memref<128x128xbf16, #tpu.memory_space<vmem>>, %arg4: memref<128x128xbf16, #tpu.memory_space<vmem>>, %arg5: memref<1x128xf32, #tpu.memory_space<vmem>>, %arg6: memref<128x128xbf16, #tpu.memory_space<vmem>>, %arg7: memref<128x128xf32, #tpu.memory_space<vmem>>) attributes {dimension_semantics = [#tpu.dimension_semantics<parallel>, #tpu.dimension_semantics<arbitrary>], iteration_bounds = array<i64: 1, 1>, scalar_prefetch = 0 : i64, scratch_operands = 1 : i64, tpu.core_type = #tpu.core_type<tc>, window_params = [{transform_indices = @transform_0, window_bounds = array<i64: 128, 128>}, {transform_indices = @transform_1, window_bounds = array<i64: 128, 128>}, {pipeline_mode = #tpu.pipeline_mode<synchronous>, transform_indices = @transform_2, window_bounds = array<i64: 128, 128>}, {pipeline_mode = #tpu.pipeline_mode<synchronous>, transform_indices = @transform_3, window_bounds = array<i64: 1, 128>}, {transform_indices = @transform_4, window_bounds = array<i64: 128, 128>}]} {
    %c0_i32 = arith.constant 0 : i32
    %0 = arith.cmpi eq, %arg1, %c0_i32 : i32
    %1 = arith.extui %0 : i1 to i32
    %c0_i32_0 = arith.constant 0 : i32
    %2 = arith.cmpi ne, %1, %c0_i32_0 : i32
    scf.if %2 {
      %cst_10 = arith.constant 0.000000e+00 : f32
      %12 = vector.broadcast %cst_10 : f32 to vector<128x128xf32>
      %c0_11 = arith.constant 0 : index
      %c0_12 = arith.constant 0 : index
      %13 = vector.load %arg7[%c0_11, %c0_12] : memref<128x128xf32, #tpu.memory_space<vmem>>, vector<128x128xf32>
      tpu.vector_store %arg7[%c0_11, %c0_12], %12 {strides = array<i32>} : memref<128x128xf32, #tpu.memory_space<vmem>>, vector<128x128xf32>,
    } else {
    }
    %c0 = arith.constant 0 : index
    %c0_1 = arith.constant 0 : index
    %3 = vector.load %arg7[%c0, %c0_1] : memref<128x128xf32, #tpu.memory_space<vmem>>, vector<128x128xf32>
    %c0_2 = arith.constant 0 : index
    %c0_3 = arith.constant 0 : index
    %4 = vector.load %arg2[%c0_2, %c0_3] : memref<128x128xbf16, #tpu.memory_space<vmem>>, vector<128x128xbf16>
    %c0_4 = arith.constant 0 : index
    %c0_5 = arith.constant 0 : index
    %5 = vector.load %arg3[%c0_4, %c0_5] : memref<128x128xbf16, #tpu.memory_space<vmem>>, vector<128x128xbf16>
    %cst = arith.constant dense<0.000000e+00> : vector<128x128xf32>
    %6 = tpu.matmul %4, %5, %cst {dimension_numbers = #tpu.dot_dimension_numbers<[1], [0], [0], [1], [0, 0, 1, 1], [], []>} : vector<128x128xbf16>, vector<128x128xbf16>, vector<128x128xf32> -> vector<128x128xf32>
    %7 = arith.addf %3, %6 : vector<128x128xf32>
    %c0_6 = arith.constant 0 : index
    %c0_7 = arith.constant 0 : index
    %8 = vector.load %arg7[%c0_6, %c0_7] : memref<128x128xf32, #tpu.memory_space<vmem>>, vector<128x128xf32>
    tpu.vector_store %arg7[%c0_6, %c0_7], %7 {strides = array<i32>} : memref<128x128xf32, #tpu.memory_space<vmem>>, vector<128x128xf32>,
    %c0_i32_8 = arith.constant 0 : i32
    %9 = arith.cmpi eq, %arg1, %c0_i32_8 : i32
    %10 = arith.extui %9 : i1 to i32
    %c0_i32_9 = arith.constant 0 : i32
    %11 = arith.cmpi ne, %10, %c0_i32_9 : i32
    scf.if %11 {
      %c0_10 = arith.constant 0 : index
      %c0_11 = arith.constant 0 : index
      %12 = vector.load %arg7[%c0_10, %c0_11] : memref<128x128xf32, #tpu.memory_space<vmem>>, vector<128x128xf32>
      %13 = arith.truncf %12 : vector<128x128xf32> to vector<128x128xbf16>
      %c0_12 = arith.constant 0 : index
      %c0_13 = arith.constant 0 : index
      %14 = vector.load %arg4[%c0_12, %c0_13] : memref<128x128xbf16, #tpu.memory_space<vmem>>, vector<128x128xbf16>
      %cst_14 = arith.constant dense<0.000000e+00> : vector<128x128xf32>
      %15 = tpu.matmul %13, %14, %cst_14 {dimension_numbers = #tpu.dot_dimension_numbers<[1], [0], [0], [1], [0, 0, 1, 1], [], []>} : vector<128x128xbf16>, vector<128x128xbf16>, vector<128x128xf32> -> vector<128x128xf32>
      %c0_15 = arith.constant 0 : index
      %c0_16 = arith.constant 0 : index
      %16 = vector.load %arg5[%c0_15, %c0_16] : memref<1x128xf32, #tpu.memory_space<vmem>>, vector<1x128xf32>
      %17 = vector.broadcast %16 : vector<1x128xf32> to vector<128x128xf32>
      %18 = arith.addf %15, %17 : vector<128x128xf32>
      %cst_17 = arith.constant 0.000000e+00 : f32
      %19 = vector.broadcast %cst_17 : f32 to vector<128x128xf32>
      %20 = arith.maximumf %18, %19 : vector<128x128xf32>
      %21 = arith.truncf %20 : vector<128x128xf32> to vector<128x128xbf16>
      %c0_18 = arith.constant 0 : index
      %c0_19 = arith.constant 0 : index
      %22 = vector.load %arg6[%c0_18, %c0_19] : memref<128x128xbf16, #tpu.memory_space<vmem>>, vector<128x128xbf16>
      tpu.vector_store %arg6[%c0_18, %c0_19], %21 {strides = array<i32>} : memref<128x128xbf16, #tpu.memory_space<vmem>>, vector<128x128xbf16>,
    } else {
    }
    return
  }
  func.func @transform_0(%arg0: i32, %arg1: i32) -> (i32, i32) {
    %c0_i32 = arith.constant 0 : i32
    return %arg0, %arg1 : i32, i32
  }
  func.func @transform_1(%arg0: i32, %arg1: i32) -> (i32, i32) {
    %c0_i32 = arith.constant 0 : i32
    %c0_i32_0 = arith.constant 0 : i32
    return %arg1, %c0_i32 : i32, i32
  }
  func.func @transform_2(%arg0: i32, %arg1: i32) -> (i32, i32) {
    %c0_i32 = arith.constant 0 : i32
    %c0_i32_0 = arith.constant 0 : i32
    %c0_i32_1 = arith.constant 0 : i32
    return %c0_i32, %c0_i32_0 : i32, i32
  }
  func.func @transform_3(%arg0: i32, %arg1: i32) -> (i32, i32) {
    %c0_i32 = arith.constant 0 : i32
    %c0_i32_0 = arith.constant 0 : i32
    %c0_i32_1 = arith.constant 0 : i32
    return %c0_i32, %c0_i32_0 : i32, i32
  }
  func.func @transform_4(%arg0: i32, %arg1: i32) -> (i32, i32) {
    %c0_i32 = arith.constant 0 : i32
    %c0_i32_0 = arith.constant 0 : i32
    return %arg0, %c0_i32 : i32, i32
  }
}

module attributes {stable_mosaic.version = 11 : i64} {
  func.func @_gcn_layer2_kernel(%arg0: i32, %arg1: i32, %arg2: memref<128x128xbf16, #tpu.memory_space<vmem>>, %arg3: memref<128x128xbf16, #tpu.memory_space<vmem>>, %arg4: memref<128x128xbf16, #tpu.memory_space<vmem>>, %arg5: memref<1x128xf32, #tpu.memory_space<vmem>>, %arg6: memref<128x128xf32, #tpu.memory_space<vmem>>, %arg7: memref<128x128xf32, #tpu.memory_space<vmem>>, %arg8: memref<128x128xf32, #tpu.memory_space<vmem>>) attributes {dimension_semantics = [#tpu.dimension_semantics<parallel>, #tpu.dimension_semantics<arbitrary>], iteration_bounds = array<i64: 1, 1>, scalar_prefetch = 0 : i64, scratch_operands = 1 : i64, tpu.core_type = #tpu.core_type<tc>, window_params = [{transform_indices = @transform_0, window_bounds = array<i64: 128, 128>}, {transform_indices = @transform_1, window_bounds = array<i64: 128, 128>}, {pipeline_mode = #tpu.pipeline_mode<synchronous>, transform_indices = @transform_2, window_bounds = array<i64: 128, 128>}, {pipeline_mode = #tpu.pipeline_mode<synchronous>, transform_indices = @transform_3, window_bounds = array<i64: 1, 128>}, {transform_indices = @transform_4, window_bounds = array<i64: 128, 128>}, {transform_indices = @transform_5, window_bounds = array<i64: 128, 128>}]} {
    %c0_i32 = arith.constant 0 : i32
    %0 = arith.cmpi eq, %arg1, %c0_i32 : i32
    %1 = arith.extui %0 : i1 to i32
    %c0_i32_0 = arith.constant 0 : i32
    %2 = arith.cmpi ne, %1, %c0_i32_0 : i32
    scf.if %2 {
      %cst_10 = arith.constant 0.000000e+00 : f32
      %12 = vector.broadcast %cst_10 : f32 to vector<128x128xf32>
      %c0_11 = arith.constant 0 : index
      %c0_12 = arith.constant 0 : index
      %13 = vector.load %arg8[%c0_11, %c0_12] : memref<128x128xf32, #tpu.memory_space<vmem>>, vector<128x128xf32>
      tpu.vector_store %arg8[%c0_11, %c0_12], %12 {strides = array<i32>} : memref<128x128xf32, #tpu.memory_space<vmem>>, vector<128x128xf32>,
    } else {
    }
    %c0 = arith.constant 0 : index
    %c0_1 = arith.constant 0 : index
    %3 = vector.load %arg8[%c0, %c0_1] : memref<128x128xf32, #tpu.memory_space<vmem>>, vector<128x128xf32>
    %c0_2 = arith.constant 0 : index
    %c0_3 = arith.constant 0 : index
    %4 = vector.load %arg2[%c0_2, %c0_3] : memref<128x128xbf16, #tpu.memory_space<vmem>>, vector<128x128xbf16>
    %c0_4 = arith.constant 0 : index
    %c0_5 = arith.constant 0 : index
    %5 = vector.load %arg3[%c0_4, %c0_5] : memref<128x128xbf16, #tpu.memory_space<vmem>>, vector<128x128xbf16>
    %cst = arith.constant dense<0.000000e+00> : vector<128x128xf32>
    %6 = tpu.matmul %4, %5, %cst {dimension_numbers = #tpu.dot_dimension_numbers<[1], [0], [0], [1], [0, 0, 1, 1], [], []>} : vector<128x128xbf16>, vector<128x128xbf16>, vector<128x128xf32> -> vector<128x128xf32>
    %7 = arith.addf %3, %6 : vector<128x128xf32>
    %c0_6 = arith.constant 0 : index
    %c0_7 = arith.constant 0 : index
    %8 = vector.load %arg8[%c0_6, %c0_7] : memref<128x128xf32, #tpu.memory_space<vmem>>, vector<128x128xf32>
    tpu.vector_store %arg8[%c0_6, %c0_7], %7 {strides = array<i32>} : memref<128x128xf32, #tpu.memory_space<vmem>>, vector<128x128xf32>,
    %c0_i32_8 = arith.constant 0 : i32
    %9 = arith.cmpi eq, %arg1, %c0_i32_8 : i32
    %10 = arith.extui %9 : i1 to i32
    %c0_i32_9 = arith.constant 0 : i32
    %11 = arith.cmpi ne, %10, %c0_i32_9 : i32
    scf.if %11 {
      %c0_10 = arith.constant 0 : index
      %c0_11 = arith.constant 0 : index
      %12 = vector.load %arg8[%c0_10, %c0_11] : memref<128x128xf32, #tpu.memory_space<vmem>>, vector<128x128xf32>
      %13 = arith.truncf %12 : vector<128x128xf32> to vector<128x128xbf16>
      %c0_12 = arith.constant 0 : index
      %c0_13 = arith.constant 0 : index
      %14 = vector.load %arg4[%c0_12, %c0_13] : memref<128x128xbf16, #tpu.memory_space<vmem>>, vector<128x128xbf16>
      %cst_14 = arith.constant dense<0.000000e+00> : vector<128x128xf32>
      %15 = tpu.matmul %13, %14, %cst_14 {dimension_numbers = #tpu.dot_dimension_numbers<[1], [0], [0], [1], [0, 0, 1, 1], [], []>} : vector<128x128xbf16>, vector<128x128xbf16>, vector<128x128xf32> -> vector<128x128xf32>
      %c0_15 = arith.constant 0 : index
      %c0_16 = arith.constant 0 : index
      %16 = vector.load %arg5[%c0_15, %c0_16] : memref<1x128xf32, #tpu.memory_space<vmem>>, vector<1x128xf32>
      %17 = vector.broadcast %16 : vector<1x128xf32> to vector<128x128xf32>
      %18 = arith.addf %15, %17 : vector<128x128xf32>
      %c0_17 = arith.constant 0 : index
      %c0_18 = arith.constant 0 : index
      %19 = vector.load %arg6[%c0_17, %c0_18] : memref<128x128xf32, #tpu.memory_space<vmem>>, vector<128x128xf32>
      tpu.vector_store %arg6[%c0_17, %c0_18], %18 {strides = array<i32>} : memref<128x128xf32, #tpu.memory_space<vmem>>, vector<128x128xf32>,
      %20 = tpu.iota {dimensions = array<i32: 1>} : vector<128x128xi32>
      %c4_i32 = arith.constant 4 : i32
      %21 = vector.broadcast %c4_i32 : i32 to vector<128x128xi32>
      %22 = arith.cmpi slt, %20, %21 : vector<128x128xi32>
      %cst_19 = arith.constant 0xFF800000 : f32
      %23 = vector.broadcast %cst_19 : f32 to vector<128x128xf32>
      %24 = arith.select %22, %18, %23 : vector<128x128xi1>, vector<128x128xf32>
      %cst_20 = arith.constant dense<0xFF800000> : vector<128xf32>
      %25 = vector.multi_reduction <maximumf>, %24, %cst_20 [1] : vector<128x128xf32> to vector<128xf32>
      %26 = vector.shape_cast %25 : vector<128xf32> to vector<128x1xf32>
      %27 = vector.broadcast %26 : vector<128x1xf32> to vector<128x128xf32>
      %28 = arith.subf %24, %27 : vector<128x128xf32>
      %29 = math.exp %28 : vector<128x128xf32>
      %cst_21 = arith.constant 0.000000e+00 : f32
      %30 = vector.broadcast %cst_21 : f32 to vector<128x128xf32>
      %31 = arith.select %22, %29, %30 : vector<128x128xi1>, vector<128x128xf32>
      %cst_22 = arith.constant dense<0.000000e+00> : vector<128xf32>
      %32 = vector.multi_reduction <add>, %31, %cst_22 [1] : vector<128x128xf32> to vector<128xf32>
      %33 = vector.shape_cast %32 : vector<128xf32> to vector<128x1xf32>
      %34 = math.log %33 : vector<128x1xf32>
      %35 = arith.addf %26, %34 : vector<128x1xf32>
      %36 = vector.broadcast %35 : vector<128x1xf32> to vector<128x128xf32>
      %37 = arith.subf %18, %36 : vector<128x128xf32>
      %cst_23 = arith.constant 0.000000e+00 : f32
      %38 = vector.broadcast %cst_23 : f32 to vector<128x128xf32>
      %39 = arith.select %22, %37, %38 : vector<128x128xi1>, vector<128x128xf32>
      %c0_24 = arith.constant 0 : index
      %c0_25 = arith.constant 0 : index
      %40 = vector.load %arg7[%c0_24, %c0_25] : memref<128x128xf32, #tpu.memory_space<vmem>>, vector<128x128xf32>
      tpu.vector_store %arg7[%c0_24, %c0_25], %39 {strides = array<i32>} : memref<128x128xf32, #tpu.memory_space<vmem>>, vector<128x128xf32>,
    } else {
    }
    return
  }
  func.func @transform_0(%arg0: i32, %arg1: i32) -> (i32, i32) {
    %c0_i32 = arith.constant 0 : i32
    return %arg0, %arg1 : i32, i32
  }
  func.func @transform_1(%arg0: i32, %arg1: i32) -> (i32, i32) {
    %c0_i32 = arith.constant 0 : i32
    %c0_i32_0 = arith.constant 0 : i32
    return %arg1, %c0_i32 : i32, i32
  }
  func.func @transform_2(%arg0: i32, %arg1: i32) -> (i32, i32) {
    %c0_i32 = arith.constant 0 : i32
    %c0_i32_0 = arith.constant 0 : i32
    %c0_i32_1 = arith.constant 0 : i32
    return %c0_i32, %c0_i32_0 : i32, i32
  }
  func.func @transform_3(%arg0: i32, %arg1: i32) -> (i32, i32) {
    %c0_i32 = arith.constant 0 : i32
    %c0_i32_0 = arith.constant 0 : i32
    %c0_i32_1 = arith.constant 0 : i32
    return %c0_i32, %c0_i32_0 : i32, i32
  }
  func.func @transform_4(%arg0: i32, %arg1: i32) -> (i32, i32) {
    %c0_i32 = arith.constant 0 : i32
    %c0_i32_0 = arith.constant 0 : i32
    return %arg0, %c0_i32 : i32, i32
  }
  func.func @transform_5(%arg0: i32, %arg1: i32) -> (i32, i32) {
    %c0_i32 = arith.constant 0 : i32
    %c0_i32_0 = arith.constant 0 : i32
    return %arg0, %c0_i32 : i32, i32
  }
}

</mosaic_0001>

<bundles_post_ra>
// kernel: gcn_forward.2
= control target key start
LH: loop header
LB: loop body
LE: loop exit
PB: predicated region body
PF: predicated region fallthrough
CT: control target
= control target key end

     0   :  { %s954_s1 = inlined_call_operand.vmem [shape: bf16[128,128], index: 1, kind: input, shape index: {}]   ;;  %s955_s0 = inlined_call_operand.vmem [shape: bf16[128,128], index: 0, kind: input, shape index: {}]   ;;  %s956_s2 = inlined_call_operand.vmem [shape: bf16[128,128], index: 2, kind: input, shape index: {}]   ;;  %s957_s3 = inlined_call_operand.vmem [shape: f32[1,128], index: 3, kind: input, shape index: {}]   ;;  %s958_s4 = inlined_call_operand.vmem [shape: bf16[128,128], index: 4, kind: output, shape index: {}]  }
   0x1   :  { %v806_v0 = vld [vmem:[%s954_s1] sm:$0xff]   ;;  %v807_v1 = vld [vmem:[%s954_s1 + $0x8] sm:$0xff]   ;;  %v808_v2 = vld [vmem:[%s954_s1 + $0x10] sm:$0xff]  }
   0x2   :  { %742 = vmatprep.subr.bf16.mxu0 %v806_v0  ;;  %v809_v3 = vld [vmem:[%s954_s1 + $0x18] sm:$0xff]   ;;  %v814_v4 = vld [vmem:[%s955_s0] sm:$0xff]   ;;  %v811_v6 = vld [vmem:[%s954_s1 + $0x28] sm:$0xff]  }
   0x3   :  { %743 = vmatpush3.bf16.msra.mxu0 %v806_v0  ;;  %758 = vmatprep.mubr.bf16.mxu0 %v814_v4  ;;  %v810_v5 = vld [vmem:[%s954_s1 + $0x20] sm:$0xff]   ;;  %v823_v8 = vld [vmem:[%s956_s2 + $0x8] sm:$0xff]   ;;  %v812_v9 = vld [vmem:[%s954_s1 + $0x30] sm:$0xff]  }
   0x4   :  { %744 = vmatprep.subr.bf16.mxu0 %v807_v1  ;;  %v822_v7 = vld [vmem:[%s956_s2] sm:$0xff]   ;;  %v824_v10 = vld [vmem:[%s956_s2 + $0x10] sm:$0xff]   ;;  %v813_v11 = vld [vmem:[%s954_s1 + $0x38] sm:$0xff]  }
   0x5   :  { %774 = vmatprep.subr.bf16.mxu1 %v822_v7  ;;  %v825_v12 = vld [vmem:[%s956_s2 + $0x18] sm:$0xff]   ;;  %v826_v13 = vld [vmem:[%s956_s2 + $0x20] sm:$0xff]   ;;  %v815_v14 = vld [vmem:[%s955_s0 + $0x8] sm:$0xff]  }
   0x6   :  { %775 = vmatpush3.bf16.msra.mxu1 %v822_v7  ;;  %v816_v15 = vld [vmem:[%s955_s0 + $0x10] sm:$0xff]   ;;  %v827_v16 = vld [vmem:[%s956_s2 + $0x28] sm:$0xff]   ;;  %v817_v18 = vld [vmem:[%s955_s0 + $0x18] sm:$0xff]  }
   0x7   :  { %745 = vmatpush3.bf16.msra.mxu0 %v807_v1  ;;  %776 = vmatprep.subr.bf16.mxu1 %v823_v8  ;;  %v828_v17 = vld [vmem:[%s956_s2 + $0x30] sm:$0xff]   ;;  %v818_v19 = vld [vmem:[%s955_s0 + $0x20] sm:$0xff]   ;;  %v819_v20 = vld [vmem:[%s955_s0 + $0x28] sm:$0xff]  }
   0x8   :  { %746 = vmatprep.subr.bf16.mxu0 %v808_v2  ;;  %v820_v21 = vld [vmem:[%s955_s0 + $0x30] sm:$0xff]   ;;  %v821_v22 = vld [vmem:[%s955_s0 + $0x38] sm:$0xff]   ;;  %v622_v48 = vld [vmem:[%s957_s3] ss:$0 sm:$0xff] }
   0x9   :  { %v829_v23 = vld [vmem:[%s956_s2 + $0x38] sm:$0xff]  }
   0xa   :  { %777 = vmatpush3.bf16.msra.mxu1 %v823_v8 }
   0xb   :  { %747 = vmatpush3.bf16.msra.mxu0 %v808_v2  ;;  %778 = vmatprep.subr.bf16.mxu1 %v824_v10 }
   0xc   :  { %748 = vmatprep.subr.bf16.mxu0 %v809_v3 }
   0xe   :  { %779 = vmatpush3.bf16.msra.mxu1 %v824_v10 }
   0xf   :  { %749 = vmatpush3.bf16.msra.mxu0 %v809_v3  ;;  %780 = vmatprep.subr.bf16.mxu1 %v825_v12 }
  0x10   :  { %750 = vmatprep.subr.bf16.mxu0 %v810_v5 }
  0x12   :  { %781 = vmatpush3.bf16.msra.mxu1 %v825_v12 }
  0x13   :  { %751 = vmatpush3.bf16.msra.mxu0 %v810_v5  ;;  %782 = vmatprep.subr.bf16.mxu1 %v826_v13 }
  0x14   :  { %752 = vmatprep.subr.bf16.mxu0 %v811_v6 }
  0x16   :  { %783 = vmatpush3.bf16.msra.mxu1 %v826_v13 }
  0x17   :  { %753 = vmatpush3.bf16.msra.mxu0 %v811_v6  ;;  %784 = vmatprep.subr.bf16.mxu1 %v827_v16 }
  0x18   :  { %754 = vmatprep.subr.bf16.mxu0 %v812_v9 }
  0x1a   :  { %785 = vmatpush3.bf16.msra.mxu1 %v827_v16 }
  0x1b   :  { %755 = vmatpush3.bf16.msra.mxu0 %v812_v9  ;;  %786 = vmatprep.subr.bf16.mxu1 %v828_v17 }
  0x1c   :  { %756 = vmatprep.subr.bf16.mxu0 %v813_v11 }
  0x1e   :  { %787 = vmatpush3.bf16.msra.mxu1 %v828_v17 }
  0x1f   :  { %757 = vmatpush3.bf16.msra.mxu0 %v813_v11  ;;  %788 = vmatprep.subr.bf16.mxu1 %v829_v23 }
  0x22   :  { %759 = vmatmul.mubr.bf16.vlgmr.msra.gmra.mrb[0].mxu0 %v815_v14  ;;  %789 = vmatpush3.bf16.msra.mxu1 %v829_v23 }
  0x23   :  { %762 = vmatprep.mubr.bf16.mxu0 %v816_v15 }
  0x2a   :  { %763 = vmatmul.mubr.bf16.gmra.mrb[4].mxu0 %v817_v18 }
  0x2b   :  { %766 = vmatprep.mubr.bf16.mxu0 %v818_v19 }
  0x32   :  { %767 = vmatmul.mubr.bf16.gmra.mrb[8].mxu0 %v819_v20 }
  0x33   :  { %770 = vmatprep.mubr.bf16.mxu0 %v820_v21 }
  0x3a   :  { %771 = vmatmul.mubr.bf16.gmra.mrb[12].mxu0 %v821_v22 }
  0xf5   :  { %v760_v24 = vpop.f32.mrb[0].mxu0 }
  0xf6   :  { %v216_v25 = vpop.f32.mrb[1].mxu0 }
  0xf7   :  { %v761_v26 = vpop.f32.mrb[2].mxu0 }
  0xf8   :  { %v331_v27 = vpack.c.bf16 %v761_v26, %v760_v24  ;;  %v219_v28 = vpop.f32.mrb[3].mxu0 }
  0xf9   :  { %v330_v29 = vpack.c.bf16 %v219_v28, %v216_v25 }
  0xfb   :  { %790 = vmatprep.mubr.bf16.mxu1 %v330_v29 }
  0xfc   :  { %791 = vmatmul.mubr.bf16.vlgmr.msra.gmra.mrb[0].mxu1 %v331_v27 }
  0xfd   :  { %v764_v30 = vpop.f32.mrb[4].mxu0 }
  0xfe   :  { %v232_v31 = vpop.f32.mrb[5].mxu0 }
  0xff   :  { %v765_v32 = vpop.f32.mrb[6].mxu0 }
 0x100   :  { %v333_v33 = vpack.c.bf16 %v765_v32, %v764_v30  ;;  %v235_v34 = vpop.f32.mrb[7].mxu0 }
 0x101   :  { %v332_v35 = vpack.c.bf16 %v235_v34, %v232_v31 }
 0x103   :  { %794 = vmatprep.mubr.bf16.mxu1 %v332_v35 }
 0x104   :  { %795 = vmatmul.mubr.bf16.gmra.mrb[4].mxu1 %v333_v33 }
 0x105   :  { %v768_v36 = vpop.f32.mrb[8].mxu0 }
 0x106   :  { %v248_v37 = vpop.f32.mrb[9].mxu0 }
 0x107   :  { %v769_v38 = vpop.f32.mrb[10].mxu0 }
 0x108   :  { %v335_v39 = vpack.c.bf16 %v769_v38, %v768_v36  ;;  %v251_v40 = vpop.f32.mrb[11].mxu0 }
 0x109   :  { %v334_v41 = vpack.c.bf16 %v251_v40, %v248_v37 }
 0x10b   :  { %798 = vmatprep.mubr.bf16.mxu1 %v334_v41 }
 0x10c   :  { %799 = vmatmul.mubr.bf16.gmra.mrb[8].mxu1 %v335_v39 }
 0x10d   :  { %v772_v42 = vpop.f32.mrb[12].mxu0 }
 0x10e   :  { %v264_v43 = vpop.f32.mrb[13].mxu0 }
 0x10f   :  { %v773_v44 = vpop.f32.mrb[14].mxu0 }
 0x110   :  { %v337_v45 = vpack.c.bf16 %v773_v44, %v772_v42  ;;  %v267_v46 = vpop.f32.mrb[15].mxu0 }
 0x111   :  { %v336_v47 = vpack.c.bf16 %v267_v46, %v264_v43 }
 0x113   :  { %802 = vmatprep.mubr.bf16.mxu1 %v336_v47 }
 0x114   :  { %803 = vmatmul.mubr.bf16.gmra.mrb[12].mxu1 %v337_v45 }
 0x1cf   :  { %v792_v49 = vpop.f32.mrb[0].mxu1 }
 0x1d0   :  { %v452_v50 = vadd.f32 %v792_v49, %v622_v48  ;;  %v443_v51 = vpop.f32.mrb[1].mxu1 }
 0x1d1   :  { %v444_v52 = vadd.f32 %v622_v48, %v443_v51  ;;  %v793_v53 = vpop.f32.mrb[2].mxu1 }
 0x1d2   :  { %v455_v54 = vadd.f32 %v793_v53, %v622_v48  ;;  %v446_v55 = vpop.f32.mrb[3].mxu1  ;;  %v508_v57 = vmax.f32 %v452_v50, 0.0 }
 0x1d3   :  { %v447_v56 = vadd.f32 %v622_v48, %v446_v55  ;;  %v506_v59 = vmax.f32 %v444_v52, 0.0 }
 0x1d4   :  { %v509_v58 = vmax.f32 %v455_v54, 0.0 }
 0x1d5   :  { %v507_v60 = vmax.f32 %v447_v56, 0.0 }
 0x1d6   :  { %v671_v61 = vpack.c.bf16 %v509_v58, %v508_v57 }
 0x1d7   :  { %v666_v62 = vpack.c.bf16 %v507_v60, %v506_v59  ;;  %v796_v63 = vpop.f32.mrb[4].mxu1 }
 0x1d8   :  { %703 = vst [vmem:[%s958_s4 + $0x8] sm:$0xff] %v671_v61   ;;  %v468_v0 = vadd.f32 %v796_v63, %v622_v48  ;;  %v459_v1 = vpop.f32.mrb[5].mxu1 }
 0x1d9   :  { %667 = vst [vmem:[%s958_s4] sm:$0xff] %v666_v62   ;;  %v460_v2 = vadd.f32 %v622_v48, %v459_v1  ;;  %v797_v3 = vpop.f32.mrb[6].mxu1 }
 0x1da   :  { %v471_v4 = vadd.f32 %v797_v3, %v622_v48  ;;  %v462_v5 = vpop.f32.mrb[7].mxu1  ;;  %v512_v7 = vmax.f32 %v468_v0, 0.0 }
 0x1db   :  { %v463_v6 = vadd.f32 %v622_v48, %v462_v5  ;;  %v510_v9 = vmax.f32 %v460_v2, 0.0 }
 0x1dc   :  { %v513_v8 = vmax.f32 %v471_v4, 0.0 }
 0x1dd   :  { %v511_v10 = vmax.f32 %v463_v6, 0.0 }
 0x1de   :  { %v681_v11 = vpack.c.bf16 %v513_v8, %v512_v7 }
 0x1df   :  { %v676_v12 = vpack.c.bf16 %v511_v10, %v510_v9  ;;  %v800_v13 = vpop.f32.mrb[8].mxu1 }
 0x1e0   :  { %705 = vst [vmem:[%s958_s4 + $0x18] sm:$0xff] %v681_v11   ;;  %v484_v14 = vadd.f32 %v800_v13, %v622_v48  ;;  %v475_v15 = vpop.f32.mrb[9].mxu1 }
 0x1e1   :  { %704 = vst [vmem:[%s958_s4 + $0x10] sm:$0xff] %v676_v12   ;;  %v476_v16 = vadd.f32 %v622_v48, %v475_v15  ;;  %v801_v17 = vpop.f32.mrb[10].mxu1 }
 0x1e2   :  { %v487_v18 = vadd.f32 %v801_v17, %v622_v48  ;;  %v478_v19 = vpop.f32.mrb[11].mxu1  ;;  %v516_v21 = vmax.f32 %v484_v14, 0.0 }
 0x1e3   :  { %v479_v20 = vadd.f32 %v622_v48, %v478_v19  ;;  %v514_v23 = vmax.f32 %v476_v16, 0.0 }
 0x1e4   :  { %v517_v22 = vmax.f32 %v487_v18, 0.0 }
 0x1e5   :  { %v515_v24 = vmax.f32 %v479_v20, 0.0 }
 0x1e6   :  { %v691_v25 = vpack.c.bf16 %v517_v22, %v516_v21 }
 0x1e7   :  { %v686_v26 = vpack.c.bf16 %v515_v24, %v514_v23  ;;  %v804_v27 = vpop.f32.mrb[12].mxu1 }
 0x1e8   :  { %707 = vst [vmem:[%s958_s4 + $0x28] sm:$0xff] %v691_v25   ;;  %v500_v28 = vadd.f32 %v804_v27, %v622_v48  ;;  %v491_v29 = vpop.f32.mrb[13].mxu1 }
 0x1e9   :  { %706 = vst [vmem:[%s958_s4 + $0x20] sm:$0xff] %v686_v26   ;;  %v492_v30 = vadd.f32 %v622_v48, %v491_v29  ;;  %v805_v31 = vpop.f32.mrb[14].mxu1 }
 0x1ea   :  { %v503_v32 = vadd.f32 %v805_v31, %v622_v48  ;;  %v494_v33 = vpop.f32.mrb[15].mxu1  ;;  %v520_v35 = vmax.f32 %v500_v28, 0.0 }
 0x1eb   :  { %v495_v34 = vadd.f32 %v622_v48, %v494_v33  ;;  %v518_v37 = vmax.f32 %v492_v30, 0.0 }
 0x1ec   :  { %v521_v36 = vmax.f32 %v503_v32, 0.0 }
 0x1ed   :  { %v519_v38 = vmax.f32 %v495_v34, 0.0 }
 0x1ee   :  { %v701_v39 = vpack.c.bf16 %v521_v36, %v520_v35 }
 0x1ef   :  { %v696_v40 = vpack.c.bf16 %v519_v38, %v518_v37 }
 0x1f0   :  { %709 = vst [vmem:[%s958_s4 + $0x38] sm:$0xff] %v701_v39  }
 0x1f1   :  { %708 = vst [vmem:[%s958_s4 + $0x30] sm:$0xff] %v696_v40  }

// kernel: gcn_forward.3
= control target key start
LH: loop header
LB: loop body
LE: loop exit
PB: predicated region body
PF: predicated region fallthrough
CT: control target
= control target key end

     0   :  { %v524_v48 = vlaneseq  ;;  %s1510_s1 = inlined_call_operand.vmem [shape: bf16[128,128], index: 1, kind: input, shape index: {}]   ;;  %s1511_s0 = inlined_call_operand.vmem [shape: bf16[128,128], index: 0, kind: input, shape index: {}]   ;;  %s1512_s2 = inlined_call_operand.vmem [shape: bf16[128,128], index: 2, kind: input, shape index: {}]   ;;  %s1513_s3 = inlined_call_operand.vmem [shape: f32[1,128], index: 3, kind: input, shape index: {}]   ;;  %s1514_s4 = inlined_call_operand.vmem [shape: f32[128,128], index: 4, kind: output, shape index: {0}]   ;;  %s1515_s5 = inlined_call_operand.vmem [shape: f32[128,128], index: 5, kind: output, shape index: {1}]  }
   0x1   :  { %v896_v0 = vld [vmem:[%s1510_s1] sm:$0xff]   ;;  %v897_v1 = vld [vmem:[%s1510_s1 + $0x8] sm:$0xff]   ;;  %v898_v2 = vld [vmem:[%s1510_s1 + $0x10] sm:$0xff]  }
   0x2   :  { %832 = vmatprep.subr.bf16.mxu0 %v896_v0  ;;  %v899_v3 = vld [vmem:[%s1510_s1 + $0x18] sm:$0xff]   ;;  %v904_v4 = vld [vmem:[%s1511_s0] sm:$0xff]   ;;  %v901_v6 = vld [vmem:[%s1510_s1 + $0x28] sm:$0xff]   ;;  %v1086_v49 = vand.u32 127, %v524_v48 }
   0x3   :  { %833 = vmatpush3.bf16.msra.mxu0 %v896_v0  ;;  %848 = vmatprep.mubr.bf16.mxu0 %v904_v4  ;;  %v900_v5 = vld [vmem:[%s1510_s1 + $0x20] sm:$0xff]   ;;  %v913_v8 = vld [vmem:[%s1512_s2 + $0x8] sm:$0xff]   ;;  %v902_v9 = vld [vmem:[%s1510_s1 + $0x30] sm:$0xff]  }
   0x4   :  { %834 = vmatprep.subr.bf16.mxu0 %v897_v1  ;;  %v912_v7 = vld [vmem:[%s1512_s2] sm:$0xff]   ;;  %v914_v10 = vld [vmem:[%s1512_s2 + $0x10] sm:$0xff]   ;;  %v903_v11 = vld [vmem:[%s1510_s1 + $0x38] sm:$0xff]   ;;  %vm526_vm0 = vcmp.lt.s32.totalorder %v1086_v49, 4 }
   0x5   :  { %864 = vmatprep.subr.bf16.mxu1 %v912_v7  ;;  %v915_v12 = vld [vmem:[%s1512_s2 + $0x18] sm:$0xff]   ;;  %v916_v13 = vld [vmem:[%s1512_s2 + $0x20] sm:$0xff]   ;;  %v905_v14 = vld [vmem:[%s1511_s0 + $0x8] sm:$0xff]  }
   0x6   :  { %865 = vmatpush3.bf16.msra.mxu1 %v912_v7  ;;  %v906_v15 = vld [vmem:[%s1511_s0 + $0x10] sm:$0xff]   ;;  %v917_v16 = vld [vmem:[%s1512_s2 + $0x28] sm:$0xff]   ;;  %v907_v18 = vld [vmem:[%s1511_s0 + $0x18] sm:$0xff]  }
   0x7   :  { %835 = vmatpush3.bf16.msra.mxu0 %v897_v1  ;;  %866 = vmatprep.subr.bf16.mxu1 %v913_v8  ;;  %v918_v17 = vld [vmem:[%s1512_s2 + $0x30] sm:$0xff]   ;;  %v908_v19 = vld [vmem:[%s1511_s0 + $0x20] sm:$0xff]   ;;  %v909_v20 = vld [vmem:[%s1511_s0 + $0x28] sm:$0xff]  }
   0x8   :  { %836 = vmatprep.subr.bf16.mxu0 %v898_v2  ;;  %v910_v21 = vld [vmem:[%s1511_s0 + $0x30] sm:$0xff]   ;;  %v911_v22 = vld [vmem:[%s1511_s0 + $0x38] sm:$0xff]   ;;  %v1091_v50 = vld [vmem:[%s1513_s3] ss:$0 sm:$0xff] }
   0x9   :  { %v919_v23 = vld [vmem:[%s1512_s2 + $0x38] sm:$0xff]  }
   0xa   :  { %867 = vmatpush3.bf16.msra.mxu1 %v913_v8 }
   0xb   :  { %837 = vmatpush3.bf16.msra.mxu0 %v898_v2  ;;  %868 = vmatprep.subr.bf16.mxu1 %v914_v10 }
   0xc   :  { %838 = vmatprep.subr.bf16.mxu0 %v899_v3 }
   0xe   :  { %869 = vmatpush3.bf16.msra.mxu1 %v914_v10 }
   0xf   :  { %839 = vmatpush3.bf16.msra.mxu0 %v899_v3  ;;  %870 = vmatprep.subr.bf16.mxu1 %v915_v12 }
  0x10   :  { %840 = vmatprep.subr.bf16.mxu0 %v900_v5 }
  0x12   :  { %871 = vmatpush3.bf16.msra.mxu1 %v915_v12 }
  0x13   :  { %841 = vmatpush3.bf16.msra.mxu0 %v900_v5  ;;  %872 = vmatprep.subr.bf16.mxu1 %v916_v13 }
  0x14   :  { %842 = vmatprep.subr.bf16.mxu0 %v901_v6 }
  0x16   :  { %873 = vmatpush3.bf16.msra.mxu1 %v916_v13 }
  0x17   :  { %843 = vmatpush3.bf16.msra.mxu0 %v901_v6  ;;  %874 = vmatprep.subr.bf16.mxu1 %v917_v16 }
  0x18   :  { %844 = vmatprep.subr.bf16.mxu0 %v902_v9 }
  0x1a   :  { %875 = vmatpush3.bf16.msra.mxu1 %v917_v16 }
  0x1b   :  { %845 = vmatpush3.bf16.msra.mxu0 %v902_v9  ;;  %876 = vmatprep.subr.bf16.mxu1 %v918_v17 }
  0x1c   :  { %846 = vmatprep.subr.bf16.mxu0 %v903_v11 }
  0x1e   :  { %877 = vmatpush3.bf16.msra.mxu1 %v918_v17 }
  0x1f   :  { %847 = vmatpush3.bf16.msra.mxu0 %v903_v11  ;;  %878 = vmatprep.subr.bf16.mxu1 %v919_v23 }
  0x22   :  { %849 = vmatmul.mubr.bf16.vlgmr.msra.gmra.mrb[0].mxu0 %v905_v14  ;;  %879 = vmatpush3.bf16.msra.mxu1 %v919_v23 }
  0x23   :  { %852 = vmatprep.mubr.bf16.mxu0 %v906_v15 }
  0x2a   :  { %853 = vmatmul.mubr.bf16.gmra.mrb[4].mxu0 %v907_v18 }
  0x2b   :  { %856 = vmatprep.mubr.bf16.mxu0 %v908_v19 }
  0x32   :  { %857 = vmatmul.mubr.bf16.gmra.mrb[8].mxu0 %v909_v20 }
  0x33   :  { %860 = vmatprep.mubr.bf16.mxu0 %v910_v21 }
  0x3a   :  { %861 = vmatmul.mubr.bf16.gmra.mrb[12].mxu0 %v911_v22 }
  0xf5   :  { %v850_v24 = vpop.f32.mrb[0].mxu0 }
  0xf6   :  { %v218_v25 = vpop.f32.mrb[1].mxu0 }
  0xf7   :  { %v851_v26 = vpop.f32.mrb[2].mxu0 }
  0xf8   :  { %v333_v27 = vpack.c.bf16 %v851_v26, %v850_v24  ;;  %v221_v28 = vpop.f32.mrb[3].mxu0 }
  0xf9   :  { %v332_v29 = vpack.c.bf16 %v221_v28, %v218_v25 }
  0xfb   :  { %880 = vmatprep.mubr.bf16.mxu1 %v332_v29 }
  0xfc   :  { %881 = vmatmul.mubr.bf16.vlgmr.msra.gmra.mrb[0].mxu1 %v333_v27 }
  0xfd   :  { %v854_v30 = vpop.f32.mrb[4].mxu0 }
  0xfe   :  { %v234_v31 = vpop.f32.mrb[5].mxu0 }
  0xff   :  { %v855_v32 = vpop.f32.mrb[6].mxu0 }
 0x100   :  { %v335_v33 = vpack.c.bf16 %v855_v32, %v854_v30  ;;  %v237_v34 = vpop.f32.mrb[7].mxu0 }
 0x101   :  { %v334_v35 = vpack.c.bf16 %v237_v34, %v234_v31 }
 0x103   :  { %884 = vmatprep.mubr.bf16.mxu1 %v334_v35 }
 0x104   :  { %885 = vmatmul.mubr.bf16.gmra.mrb[4].mxu1 %v335_v33 }
 0x105   :  { %v858_v36 = vpop.f32.mrb[8].mxu0 }
 0x106   :  { %v250_v37 = vpop.f32.mrb[9].mxu0 }
 0x107   :  { %v859_v38 = vpop.f32.mrb[10].mxu0 }
 0x108   :  { %v337_v39 = vpack.c.bf16 %v859_v38, %v858_v36  ;;  %v253_v40 = vpop.f32.mrb[11].mxu0 }
 0x109   :  { %v336_v41 = vpack.c.bf16 %v253_v40, %v250_v37 }
 0x10b   :  { %888 = vmatprep.mubr.bf16.mxu1 %v336_v41 }
 0x10c   :  { %889 = vmatmul.mubr.bf16.gmra.mrb[8].mxu1 %v337_v39 }
 0x10d   :  { %v862_v42 = vpop.f32.mrb[12].mxu0 }
 0x10e   :  { %v266_v43 = vpop.f32.mrb[13].mxu0 }
 0x10f   :  { %v863_v44 = vpop.f32.mrb[14].mxu0 }
 0x110   :  { %v339_v45 = vpack.c.bf16 %v863_v44, %v862_v42  ;;  %v269_v46 = vpop.f32.mrb[15].mxu0 }
 0x111   :  { %v338_v47 = vpack.c.bf16 %v269_v46, %v266_v43 }
 0x113   :  { %892 = vmatprep.mubr.bf16.mxu1 %v338_v47 }
 0x114   :  { %893 = vmatmul.mubr.bf16.gmra.mrb[12].mxu1 %v339_v45 }
 0x1cf   :  { %v882_v51 = vpop.f32.mrb[0].mxu1 }
 0x1d0   :  { %v1095_v52 = vadd.f32 %v882_v51, %v1091_v50  ;;  %v445_v53 = vpop.f32.mrb[1].mxu1 }
 0x1d1   :  { %v1098_v54 = vadd.f32 %v1091_v50, %v445_v53  ;;  %v883_v55 = vpop.f32.mrb[2].mxu1 }
 0x1d2   :  { %510 = vst [vmem:[%s1514_s4 + $0x10] sm:$0xff] %v1095_v52  ;;  %v1105_v56 = vadd.f32 %v883_v55, %v1091_v50  ;;  %v448_v57 = vpop.f32.mrb[3].mxu1  ;;  %v1110_v58 = vsel %vm526_vm0, %v1095_v52, -inf }
 0x1d3   :  { %508 = vst [vmem:[%s1514_s4] sm:$0xff] %v1098_v54  ;;  %v1117_v59 = vadd.f32 %v1091_v50, %v448_v57  ;;  %547 = vmax.xlane.f32.xlu1 %v1110_v58  ;;  %v1123_v60 = vsel %vm526_vm0, %v1098_v54, -inf }
 0x1d4   :  { %511 = vst [vmem:[%s1514_s4 + $0x18] sm:$0xff] %v1105_v56  ;;  %543 = vmax.xlane.f32.xlu0 %v1123_v60  ;;  %v1137_v61 = vsel %vm526_vm0, %v1105_v56, -inf }
 0x1d5   :  { %509 = vst [vmem:[%s1514_s4 + $0x8] sm:$0xff] %v1117_v59  ;;  %v1143_v63 = vsel %vm526_vm0, %v1117_v59, -inf }
 0x1d7   :  { %549 = vmax.xlane.f32.xlu1 %v1137_v61  ;;  %v886_v62 = vpop.f32.mrb[4].mxu1 }
 0x1d8   :  { %v1146_v0 = vadd.f32 %v886_v62, %v1091_v50  ;;  %545 = vmax.xlane.f32.xlu0 %v1143_v63  ;;  %v461_v1 = vpop.f32.mrb[5].mxu1 }
 0x1d9   :  { %v1150_v2 = vadd.f32 %v1091_v50, %v461_v1  ;;  %v887_v3 = vpop.f32.mrb[6].mxu1 }
 0x1da   :  { %514 = vst [vmem:[%s1514_s4 + $0x30] sm:$0xff] %v1146_v0  ;;  %v1157_v4 = vadd.f32 %v887_v3, %v1091_v50  ;;  %v464_v5 = vpop.f32.mrb[7].mxu1  ;;  %v1162_v6 = vsel %vm526_vm0, %v1146_v0, -inf }
 0x1db   :  { %512 = vst [vmem:[%s1514_s4 + $0x20] sm:$0xff] %v1150_v2  ;;  %v1169_v7 = vadd.f32 %v1091_v50, %v464_v5  ;;  %v1189_v10 = vsel %vm526_vm0, %v1150_v2, -inf }
 0x1dc   :  { %515 = vst [vmem:[%s1514_s4 + $0x38] sm:$0xff] %v1157_v4  ;;  %555 = vmax.xlane.f32.xlu0 %v1162_v6  ;;  %v1179_v8 = vsel %vm526_vm0, %v1157_v4, -inf }
 0x1dd   :  { %513 = vst [vmem:[%s1514_s4 + $0x28] sm:$0xff] %v1169_v7  ;;  %557 = vmax.xlane.f32.xlu1 %v1179_v8  ;;  %v1198_v13 = vsel %vm526_vm0, %v1169_v7, -inf }
 0x1df   :  { %v890_v9 = vpop.f32.mrb[8].mxu1 }
 0x1e0   :  { %v1192_v11 = vadd.f32 %v890_v9, %v1091_v50  ;;  %551 = vmax.xlane.f32.xlu0 %v1189_v10  ;;  %v477_v12 = vpop.f32.mrb[9].mxu1 }
 0x1e1   :  { %v1201_v14 = vadd.f32 %v1091_v50, %v477_v12  ;;  %553 = vmax.xlane.f32.xlu1 %v1198_v13  ;;  %v891_v15 = vpop.f32.mrb[10].mxu1 }
 0x1e2   :  { %518 = vst [vmem:[%s1514_s4 + $0x50] sm:$0xff] %v1192_v11  ;;  %v1209_v16 = vadd.f32 %v891_v15, %v1091_v50  ;;  %v480_v17 = vpop.f32.mrb[11].mxu1  ;;  %v1214_v18 = vsel %vm526_vm0, %v1192_v11, -inf }
 0x1e3   :  { %516 = vst [vmem:[%s1514_s4 + $0x40] sm:$0xff] %v1201_v14  ;;  %v1221_v19 = vadd.f32 %v1091_v50, %v480_v17  ;;  %v1241_v22 = vsel %vm526_vm0, %v1201_v14, -inf }
 0x1e4   :  { %519 = vst [vmem:[%s1514_s4 + $0x58] sm:$0xff] %v1209_v16  ;;  %563 = vmax.xlane.f32.xlu0 %v1214_v18  ;;  %v1231_v20 = vsel %vm526_vm0, %v1209_v16, -inf }
 0x1e5   :  { %517 = vst [vmem:[%s1514_s4 + $0x48] sm:$0xff] %v1221_v19  ;;  %565 = vmax.xlane.f32.xlu1 %v1231_v20  ;;  %v1250_v25 = vsel %vm526_vm0, %v1221_v19, -inf }
 0x1e7   :  { %v894_v21 = vpop.f32.mrb[12].mxu1 }
 0x1e8   :  { %v1244_v23 = vadd.f32 %v894_v21, %v1091_v50  ;;  %559 = vmax.xlane.f32.xlu0 %v1241_v22  ;;  %v493_v24 = vpop.f32.mrb[13].mxu1 }
 0x1e9   :  { %v1253_v26 = vadd.f32 %v1091_v50, %v493_v24  ;;  %561 = vmax.xlane.f32.xlu1 %v1250_v25  ;;  %v895_v27 = vpop.f32.mrb[14].mxu1 }
 0x1ea   :  { %522 = vst [vmem:[%s1514_s4 + $0x70] sm:$0xff] %v1244_v23  ;;  %v1261_v28 = vadd.f32 %v895_v27, %v1091_v50  ;;  %v496_v29 = vpop.f32.mrb[15].mxu1  ;;  %v1293_v33 = vsel %vm526_vm0, %v1244_v23, -inf }
 0x1eb   :  { %520 = vst [vmem:[%s1514_s4 + $0x60] sm:$0xff] %v1253_v26  ;;  %v1268_v30 = vadd.f32 %v1091_v50, %v496_v29  ;;  %v1273_v31 = vsel %vm526_vm0, %v1253_v26, -inf }
 0x1ec   :  { %523 = vst [vmem:[%s1514_s4 + $0x78] sm:$0xff] %v1261_v28  ;;  %567 = vmax.xlane.f32.xlu0 %v1273_v31  ;;  %v1299_v34 = vsel %vm526_vm0, %v1261_v28, -inf }
 0x1ed   :  { %521 = vst [vmem:[%s1514_s4 + $0x68] sm:$0xff] %v1268_v30  ;;  %v1287_v32 = vsel %vm526_vm0, %v1268_v30, -inf }
 0x1ee   :  { %569 = vmax.xlane.f32.xlu1 %v1287_v32 }
 0x1f0   :  { %571 = vmax.xlane.f32.xlu0 %v1293_v33 }
 0x1f2   :  { %573 = vmax.xlane.f32.xlu1 %v1299_v34 }
 0x260   :  { %v1302_v35 = vpop.xlane.xlu1 %547 }
 0x261   :  { %v577_v36 = vsub.f32 %v1110_v58, %v1302_v35  ;;  %v1306_v37 = vpop.xlane.xlu0 %543 }
 0x262   :  { %v575_v38 = vsub.f32 %v1123_v60, %v1306_v37 }
 0x263   :  { %v595_v39 = vmul.f32 1.442695, %v577_v36 }
 0x264   :  { %v591_v40 = vmul.f32 1.442695, %v575_v38  ;;  %v1310_v41 = vpop.xlane.xlu1 %549 }
 0x265   :  { %920 = vpow2.f32 %v595_v39  ;;  %v578_v42 = vsub.f32 %v1137_v61, %v1310_v41  ;;  %v1314_v43 = vpop.xlane.xlu0 %545 }
 0x266   :  { %v576_v44 = vsub.f32 %v1143_v63, %v1314_v43  ;;  %922 = vpow2.f32 %v591_v40 }
 0x267   :  { %v597_v45 = vmul.f32 1.442695, %v578_v42 }
 0x268   :  { %v593_v46 = vmul.f32 1.442695, %v576_v44 }
 0x269   :  { %924 = vpow2.f32 %v597_v45  ;;  %v1318_v47 = vpop.xlane.xlu0 %555 }
 0x26a   :  { %v581_v48 = vsub.f32 %v1162_v6, %v1318_v47  ;;  %v1322_v50 = vpop.xlane.xlu1 %557  ;;  %926 = vpow2.f32 %v593_v46 }
 0x26b   :  { %v582_v51 = vsub.f32 %v1179_v8, %v1322_v50 }
 0x26c   :  { %v603_v53 = vmul.f32 1.442695, %v581_v48 }
 0x26d   :  { %v605_v55 = vmul.f32 1.442695, %v582_v51  ;;  %v1326_v57 = vpop.xlane.xlu0 %551 }
 0x26e   :  { %928 = vpow2.f32 %v603_v53  ;;  %v579_v58 = vsub.f32 %v1189_v10, %v1326_v57  ;;  %v1330_v60 = vpop.xlane.xlu1 %553 }
 0x26f   :  { %v921_v61 = vpop.eup %920  ;;  %930 = vpow2.f32 %v605_v55  ;;  %v580_v62 = vsub.f32 %v1198_v13, %v1330_v60 }
 0x270   :  { %v599_v63 = vmul.f32 1.442695, %v579_v58  ;;  %v625_v1 = vsel %vm526_vm0, %v921_v61, 0.0  ;;  %v923_v3 = vpop.eup %922 }
 0x271   :  { %v601_v5 = vmul.f32 1.442695, %v580_v62  ;;  %v1336_v6 = vpop.xlane.xlu0 %563  ;;  %643 = vadd.xlane.f32.xlu0 %v625_v1  ;;  %v623_v17 = vsel %vm526_vm0, %v923_v3, 0.0 }
 0x272   :  { %932 = vpow2.f32 %v599_v63  ;;  %v585_v8 = vsub.f32 %v1214_v18, %v1336_v6  ;;  %v1340_v9 = vpop.xlane.xlu1 %565 }
 0x273   :  { %v925_v10 = vpop.eup %924  ;;  %934 = vpow2.f32 %v601_v5  ;;  %v586_v12 = vsub.f32 %v1231_v20, %v1340_v9 }
 0x274   :  { %v611_v13 = vmul.f32 1.442695, %v585_v8  ;;  %v626_v15 = vsel %vm526_vm0, %v925_v10, 0.0  ;;  %v927_v21 = vpop.eup %926 }
 0x275   :  { %v613_v24 = vmul.f32 1.442695, %v586_v12  ;;  %v1348_v27 = vpop.xlane.xlu0 %559  ;;  %645 = vadd.xlane.f32.xlu1 %v626_v15  ;;  %639 = vadd.xlane.f32.xlu0 %v623_v17  ;;  %v624_v39 = vsel %vm526_vm0, %v927_v21, 0.0 }
 0x276   :  { %936 = vpow2.f32 %v611_v13  ;;  %v583_v18 = vsub.f32 %v1241_v22, %v1348_v27  ;;  %v1352_v29 = vpop.xlane.xlu1 %561 }
 0x277   :  { %938 = vpow2.f32 %v613_v24  ;;  %v584_v20 = vsub.f32 %v1250_v25, %v1352_v29 }
 0x278   :  { %v929_v36 = vpop.eup %928  ;;  %v607_v38 = vmul.f32 1.442695, %v583_v18 }
 0x279   :  { %v931_v40 = vpop.eup %930  ;;  %v609_v42 = vmul.f32 1.442695, %v584_v20  ;;  %641 = vadd.xlane.f32.xlu1 %v624_v39  ;;  %v1358_v44 = vpop.xlane.xlu0 %567  ;;  %v629_v45 = vsel %vm526_vm0, %v929_v36, 0.0 }
 0x27a   :  { %940 = vpow2.f32 %v607_v38  ;;  %v587_v22 = vsub.f32 %v1273_v31, %v1358_v44  ;;  %651 = vadd.xlane.f32.xlu0 %v629_v45  ;;  %v630_v53 = vsel %vm526_vm0, %v931_v40, 0.0 }
 0x27b   :  { %942 = vpow2.f32 %v609_v42  ;;  %v1364_v25 = vpop.xlane.xlu1 %569 }
 0x27c   :  { %v933_v46 = vpop.eup %932  ;;  %v615_v48 = vmul.f32 1.442695, %v587_v22  ;;  %v588_v51 = vsub.f32 %v1287_v32, %v1364_v25 }
 0x27d   :  { %v935_v55 = vpop.eup %934  ;;  %653 = vadd.xlane.f32.xlu1 %v630_v53  ;;  %v1370_v58 = vpop.xlane.xlu0 %571  ;;  %v627_v61 = vsel %vm526_vm0, %v933_v46, 0.0 }
 0x27e   :  { %944 = vpow2.f32 %v615_v48  ;;  %v617_v31 = vmul.f32 1.442695, %v588_v51  ;;  %v589_v62 = vsub.f32 %v1293_v33, %v1370_v58  ;;  %647 = vadd.xlane.f32.xlu0 %v627_v61  ;;  %v628_v5 = vsel %vm526_vm0, %v935_v55, 0.0 }
 0x27f   :  { %v1376_v63 = vpop.xlane.xlu1 %573 }
 0x280   :  { %v937_v1 = vpop.eup %936  ;;  %946 = vpow2.f32 %v617_v31  ;;  %v619_v32 = vmul.f32 1.442695, %v589_v62  ;;  %v590_v3 = vsub.f32 %v1299_v34, %v1376_v63 }
 0x281   :  { %v939_v8 = vpop.eup %938  ;;  %649 = vadd.xlane.f32.xlu1 %v628_v5  ;;  %v633_v10 = vsel %vm526_vm0, %v937_v1, 0.0 }
 0x282   :  { %948 = vpow2.f32 %v619_v32  ;;  %v621_v12 = vmul.f32 1.442695, %v590_v3  ;;  %659 = vadd.xlane.f32.xlu0 %v633_v10  ;;  %v634_v13 = vsel %vm526_vm0, %v939_v8, 0.0 }
 0x284   :  { %v941_v33 = vpop.eup %940  ;;  %950 = vpow2.f32 %v621_v12 }
 0x285   :  { %v943_v15 = vpop.eup %942  ;;  %661 = vadd.xlane.f32.xlu1 %v634_v13  ;;  %v631_v34 = vsel %vm526_vm0, %v941_v33, 0.0 }
 0x286   :  { %655 = vadd.xlane.f32.xlu0 %v631_v34  ;;  %v632_v21 = vsel %vm526_vm0, %v943_v15, 0.0 }
 0x288   :  { %v945_v17 = vpop.eup %944 }
 0x289   :  { %657 = vadd.xlane.f32.xlu1 %v632_v21  ;;  %v635_v24 = vsel %vm526_vm0, %v945_v17, 0.0 }
 0x28a   :  { %v947_v18 = vpop.eup %946  ;;  %663 = vadd.xlane.f32.xlu0 %v635_v24 }
 0x28b   :  { %v636_v20 = vsel %vm526_vm0, %v947_v18, 0.0 }
 0x28c   :  { %v949_v36 = vpop.eup %948 }
 0x28d   :  { %665 = vadd.xlane.f32.xlu1 %v636_v20  ;;  %v637_v38 = vsel %vm526_vm0, %v949_v36, 0.0 }
 0x28e   :  { %v951_v39 = vpop.eup %950  ;;  %667 = vadd.xlane.f32.xlu0 %v637_v38 }
 0x28f   :  { %v638_v40 = vsel %vm526_vm0, %v951_v39, 0.0 }
 0x291   :  { %669 = vadd.xlane.f32.xlu1 %v638_v40 }
 0x2fe   :  { %v644_v42 = vpop.xlane.xlu0 %643 }
 0x2ff   :  { %952 = vlog2.f32 %v644_v42 }
 0x302   :  { %v646_v45 = vpop.xlane.xlu1 %645  ;;  %v640_v22 = vpop.xlane.xlu0 %639 }
 0x303   :  { %954 = vlog2.f32 %v646_v45 }
 0x304   :  { %956 = vlog2.f32 %v640_v22 }
 0x306   :  { %v642_v46 = vpop.xlane.xlu1 %641 }
 0x307   :  { %958 = vlog2.f32 %v642_v46  ;;  %v652_v48 = vpop.xlane.xlu0 %651 }
 0x308   :  { %960 = vlog2.f32 %v652_v48 }
 0x309   :  { %v953_v51 = vpop.eup %952 }
 0x30a   :  { %v676_v53 = vmul.f32 0.6931472, %v953_v51  ;;  %v654_v55 = vpop.xlane.xlu1 %653 }
 0x30b   :  { %962 = vlog2.f32 %v654_v55  ;;  %v648_v61 = vpop.xlane.xlu0 %647 }
 0x30c   :  { %v705_v31 = vadd.f32 %v676_v53, %v1302_v35  ;;  %964 = vlog2.f32 %v648_v61 }
 0x30d   :  { %v955_v62 = vpop.eup %954 }
 0x30e   :  { %v957_v1 = vpop.eup %956  ;;  %v721_v32 = vsub.f32 %v1095_v52, %v705_v31  ;;  %v678_v3 = vmul.f32 0.6931472, %v955_v62  ;;  %v650_v5 = vpop.xlane.xlu1 %649 }
 0x30f   :  { %v672_v8 = vmul.f32 0.6931472, %v957_v1  ;;  %966 = vlog2.f32 %v650_v5  ;;  %v660_v10 = vpop.xlane.xlu0 %659 }
 0x310   :  { %v737_v12 = vsel %vm526_vm0, %v721_v32, 0.0  ;;  %v706_v33 = vadd.f32 %v678_v3, %v1310_v41  ;;  %968 = vlog2.f32 %v660_v10 }
 0x311   :  { %v959_v13 = vpop.eup %958  ;;  %753 = vst [vmem:[%s1515_s5 + $0x10] sm:$0xff] %v737_v12  ;;  %v703_v35 = vadd.f32 %v672_v8, %v1306_v37 }
 0x312   :  { %v961_v15 = vpop.eup %960  ;;  %v722_v52 = vsub.f32 %v1105_v56, %v706_v33  ;;  %v674_v34 = vmul.f32 0.6931472, %v959_v13  ;;  %v662_v17 = vpop.xlane.xlu1 %661 }
 0x313   :  { %v719_v21 = vsub.f32 %v1098_v54, %v703_v35  ;;  %v684_v24 = vmul.f32 0.6931472, %v961_v15  ;;  %970 = vlog2.f32 %v662_v17  ;;  %v656_v18 = vpop.xlane.xlu0 %655 }
 0x314   :  { %v738_v41 = vsel %vm526_vm0, %v722_v52, 0.0  ;;  %v704_v20 = vadd.f32 %v674_v34, %v1314_v43  ;;  %972 = vlog2.f32 %v656_v18 }
 0x315   :  { %v963_v36 = vpop.eup %962  ;;  %754 = vst [vmem:[%s1515_s5 + $0x18] sm:$0xff] %v738_v41  ;;  %v735_v56 = vsel %vm526_vm0, %v719_v21, 0.0  ;;  %v709_v37 = vadd.f32 %v684_v24, %v1318_v47 }
 0x316   :  { %v965_v54 = vpop.eup %964  ;;  %751 = vst [vmem:[%s1515_s5] sm:$0xff] %v735_v56  ;;  %v720_v38 = vsub.f32 %v1117_v59, %v704_v20  ;;  %v686_v39 = vmul.f32 0.6931472, %v963_v36  ;;  %v658_v43 = vpop.xlane.xlu1 %657 }
 0x317   :  { %v725_v40 = vsub.f32 %v1146_v0, %v709_v37  ;;  %v680_v42 = vmul.f32 0.6931472, %v965_v54  ;;  %974 = vlog2.f32 %v658_v43  ;;  %v664_v45 = vpop.xlane.xlu0 %663 }
 0x318   :  { %v736_v22 = vsel %vm526_vm0, %v720_v38, 0.0  ;;  %v710_v46 = vadd.f32 %v686_v39, %v1322_v50  ;;  %976 = vlog2.f32 %v664_v45 }
 0x319   :  { %v967_v47 = vpop.eup %966  ;;  %752 = vst [vmem:[%s1515_s5 + $0x8] sm:$0xff] %v736_v22  ;;  %v741_v59 = vsel %vm526_vm0, %v725_v40, 0.0  ;;  %v707_v48 = vadd.f32 %v680_v42, %v1326_v57 }
 0x31a   :  { %v969_v0 = vpop.eup %968  ;;  %757 = vst [vmem:[%s1515_s5 + $0x30] sm:$0xff] %v741_v59  ;;  %v726_v51 = vsub.f32 %v1157_v4, %v710_v46  ;;  %v682_v53 = vmul.f32 0.6931472, %v967_v47  ;;  %v666_v50 = vpop.xlane.xlu1 %665 }
 0x31b   :  { %v723_v55 = vsub.f32 %v1150_v2, %v707_v48  ;;  %v692_v61 = vmul.f32 0.6931472, %v969_v0  ;;  %978 = vlog2.f32 %v666_v50  ;;  %v668_v31 = vpop.xlane.xlu0 %667 }
 0x31c   :  { %v742_v62 = vsel %vm526_vm0, %v726_v51, 0.0  ;;  %v708_v1 = vadd.f32 %v682_v53, %v1330_v60  ;;  %980 = vlog2.f32 %v668_v31 }
 0x31d   :  { %v971_v57 = vpop.eup %970  ;;  %758 = vst [vmem:[%s1515_s5 + $0x38] sm:$0xff] %v742_v62  ;;  %v739_v4 = vsel %vm526_vm0, %v723_v55, 0.0  ;;  %v713_v32 = vadd.f32 %v692_v61, %v1336_v6 }
 0x31e   :  { %v973_v2 = vpop.eup %972  ;;  %755 = vst [vmem:[%s1515_s5 + $0x20] sm:$0xff] %v739_v4  ;;  %v724_v3 = vsub.f32 %v1169_v7, %v708_v1  ;;  %v694_v5 = vmul.f32 0.6931472, %v971_v57  ;;  %v670_v60 = vpop.xlane.xlu1 %669 }
 0x31f   :  { %v729_v8 = vsub.f32 %v1192_v11, %v713_v32  ;;  %v688_v10 = vmul.f32 0.6931472, %v973_v2  ;;  %982 = vlog2.f32 %v670_v60 }
 0x320   :  { %v740_v12 = vsel %vm526_vm0, %v724_v3, 0.0  ;;  %v714_v33 = vadd.f32 %v694_v5, %v1340_v9 }
 0x321   :  { %v975_v13 = vpop.eup %974  ;;  %756 = vst [vmem:[%s1515_s5 + $0x28] sm:$0xff] %v740_v12  ;;  %v745_v6 = vsel %vm526_vm0, %v729_v8, 0.0  ;;  %v711_v7 = vadd.f32 %v688_v10, %v1348_v27 }
 0x322   :  { %v977_v35 = vpop.eup %976  ;;  %761 = vst [vmem:[%s1515_s5 + $0x50] sm:$0xff] %v745_v6  ;;  %v730_v11 = vsub.f32 %v1209_v16, %v714_v33  ;;  %v690_v15 = vmul.f32 0.6931472, %v975_v13 }
 0x323   :  { %v727_v9 = vsub.f32 %v1201_v14, %v711_v7  ;;  %v696_v52 = vmul.f32 0.6931472, %v977_v35 }
 0x324   :  { %v746_v34 = vsel %vm526_vm0, %v730_v11, 0.0  ;;  %v712_v17 = vadd.f32 %v690_v15, %v1352_v29 }
 0x325   :  { %v979_v21 = vpop.eup %978  ;;  %762 = vst [vmem:[%s1515_s5 + $0x58] sm:$0xff] %v746_v34  ;;  %v743_v27 = vsel %vm526_vm0, %v727_v9, 0.0  ;;  %v715_v24 = vadd.f32 %v696_v52, %v1358_v44 }
 0x326   :  { %v981_v16 = vpop.eup %980  ;;  %759 = vst [vmem:[%s1515_s5 + $0x40] sm:$0xff] %v743_v27  ;;  %v728_v14 = vsub.f32 %v1221_v19, %v712_v17  ;;  %v698_v18 = vmul.f32 0.6931472, %v979_v21 }
 0x327   :  { %v731_v29 = vsub.f32 %v1253_v26, %v715_v24  ;;  %v700_v41 = vmul.f32 0.6931472, %v981_v16 }
 0x328   :  { %v744_v20 = vsel %vm526_vm0, %v728_v14, 0.0  ;;  %v716_v36 = vadd.f32 %v698_v18, %v1364_v25 }
 0x329   :  { %v983_v56 = vpop.eup %982  ;;  %760 = vst [vmem:[%s1515_s5 + $0x48] sm:$0xff] %v744_v20  ;;  %v747_v44 = vsel %vm526_vm0, %v731_v29, 0.0  ;;  %v717_v37 = vadd.f32 %v700_v41, %v1370_v58 }
 0x32a   :  { %763 = vst [vmem:[%s1515_s5 + $0x60] sm:$0xff] %v747_v44  ;;  %v732_v19 = vsub.f32 %v1268_v30, %v716_v36  ;;  %v702_v26 = vmul.f32 0.6931472, %v983_v56 }
 0x32b   :  { %v733_v54 = vsub.f32 %v1244_v23, %v717_v37 }
 0x32c   :  { %v748_v25 = vsel %vm526_vm0, %v732_v19, 0.0  ;;  %v718_v38 = vadd.f32 %v702_v26, %v1376_v63 }
 0x32d   :  { %764 = vst [vmem:[%s1515_s5 + $0x68] sm:$0xff] %v748_v25  ;;  %v749_v58 = vsel %vm526_vm0, %v733_v54, 0.0 }
 0x32e   :  { %765 = vst [vmem:[%s1515_s5 + $0x70] sm:$0xff] %v749_v58  ;;  %v734_v30 = vsub.f32 %v1261_v28, %v718_v38 }
 0x330   :  { %v750_v23 = vsel %vm526_vm0, %v734_v30, 0.0 }
 0x331   :  { %766 = vst [vmem:[%s1515_s5 + $0x78] sm:$0xff] %v750_v23 }

</bundles_post_ra>
